<compile_context>
chip_gen: v5e
topology: v5e:2x2
jax: 0.10.0
libtpu: 0.0.40
codegen_flags: <defaults>
</compile_context>

<pallas_src>
import functools

import jax
import jax.numpy as jnp
import numpy as np
from jax import lax
from jax.experimental import pallas as pl
from jax.experimental.pallas import tpu as pltpu


def _round_up(x, m):
    return (x + m - 1) // m * m


def _sepconv_kernel(x_ref, wf_ref, b_ref, o_ref, *,
                    bn, KH, KW, W, Lw, Cin_p, Cout):
    """Fused depthwise+pointwise conv as a single im2col GEMM per image.

    x_ref : (bn, Cin_p, H*W + KW - 1)  VMEM  (flattened, channel/row zero-padded)
    wf_ref: (Cout, KH*KW*Cin_p)        VMEM  (fused depthwise*pointwise weights)
    b_ref : (Cout, 1)                  VMEM  (pointwise bias, f32)
    o_ref : (bn, Cout, Lw)             Lw = OH*W (lane-dense; wrapper trims cols)
    """
    wf = wf_ref[...]                       # (Cout, KH*KW*Cin_p) -> MXU lhs
    bias = b_ref[...]                      # (Cout, 1), f32

    # depthwise taps = static lane shifts of the flattened (row-major) image
    shifts = [kh * W + kw for kh in range(KH) for kw in range(KW)]

    for b in range(bn):                    # static unroll; bn is small
        x_b = x_ref[b]                     # (Cin_p, H*W + KW - 1)
        # im2col: stack the KH*KW lane-shifted views -> (KH*KW*Cin_p, Lw).
        # Each piece is Cin_p (multiple of 8) sublanes tall -> aligned concat.
        patches = jnp.concatenate([x_b[:, s:s + Lw] for s in shifts], axis=0)
        # single MXU matmul, f32 accumulation; bias folded into the epilogue.
        y = jnp.dot(wf, patches, preferred_element_type=jnp.float32) + bias
        o_ref[b] = y.astype(o_ref.dtype)


@functools.partial(jax.jit, static_argnames=("images_per_step",))
def separable_conv2d_nchw(x_nchw, w_dw, w_pw, bias, *, images_per_step=None):
    """x_nchw: (N, Cin, H, W); w_dw: (Cin, 1, KH, KW) (torch depthwise layout);
    w_pw: (Cout, Cin, 1, 1); bias: (Cout,).  Returns (N, Cout, OH, OW).

    Matches SeparableConv2d defaults: stride=1, padding=0, dilation=1, zeros,
    norm=None, activation=None.
    """
    N, Cin, H, W = x_nchw.shape
    KH, KW = int(w_dw.shape[2]), int(w_dw.shape[3])
    Cout = int(w_pw.shape[0])
    OH, OW = H - KH + 1, W - KW + 1          # stride=1, dilation=1, padding=0

    Cin_p = _round_up(Cin, 8)                # sublane-aligned channel count
    Lw = OH * W                              # lane-dense "wide" output width
    KT = KH * KW * Cin_p                     # GEMM contraction length
    HWp = H * W + (KW - 1)                   # flat length covering the max tap shift

    bn = N if images_per_step is None else int(images_per_step)
    assert N % bn == 0, "images_per_step must divide the batch"

    dtype = x_nchw.dtype
    itemsize = jnp.dtype(dtype).itemsize

    # ---- parameter prep: fused weights, final dtype/layout, done once ---------
    dw_t = w_dw[:, 0]                        # (Cin, KH, KW)
    pw2 = w_pw[:, :, 0, 0]                   # (Cout, Cin)
    # wf[o, (kh*KW + kw)*Cin_p + c] = dw[c,kh,kw] * pw[o,c]  (0 for padded c)
    wf = pw2[:, None, None, :] * jnp.transpose(dw_t, (1, 2, 0))[None]   # (Cout,KH,KW,Cin)
    wf = jnp.pad(wf, ((0, 0), (0, 0), (0, 0), (0, Cin_p - Cin)))
    wf2 = wf.reshape(Cout, KT).astype(dtype)
    b2 = bias.reshape(Cout, 1).astype(jnp.float32)

    # ---- input prep: free reshape + small zero pad (NO transposes) ------------
    x_flat = jnp.pad(x_nchw.reshape(N, Cin, H * W),
                     ((0, 0), (0, Cin_p - Cin), (0, KW - 1)))            # (N,Cin_p,HWp)

    kernel = functools.partial(_sepconv_kernel, bn=bn, KH=KH, KW=KW, W=W,
                               Lw=Lw, Cin_p=Cin_p, Cout=Cout)

    cost = pl.CostEstimate(
        flops=2 * N * Cout * KT * Lw,
        transcendentals=0,
        bytes_accessed=(N * Cin_p * HWp + Cout * KT + N * Cout * Lw) * itemsize
                       + Cout * 4)

    out_wide = pl.pallas_call(
        kernel,
        out_shape=jax.ShapeDtypeStruct((N, Cout, Lw), dtype),
        grid=(N // bn,),
        in_specs=[
            pl.BlockSpec((bn, Cin_p, HWp), lambda i: (i, 0, 0)),
            pl.BlockSpec((Cout, KT), lambda i: (0, 0)),
            pl.BlockSpec((Cout, 1), lambda i: (0, 0)),
        ],
        out_specs=pl.BlockSpec((bn, Cout, Lw), lambda i: (i, 0, 0)),
        compiler_params=pltpu.CompilerParams(
            dimension_semantics=("parallel",)),
        cost_estimate=cost,
    )(x_flat, wf2, b2)

    # drop the (W - OW) wrap columns of each output row: cheap slice, no transpose
    return out_wide.reshape(N, Cout, OH, W)[:, :, :, :OW]


def _reference_nchw(x, w_dw, w_pw, bias):
    """Pure-JAX reference matching F.conv2d semantics (padding=0, stride=1)."""
    Cin = x.shape[1]
    y = lax.conv_general_dilated(
        x, w_dw, window_strides=(1, 1), padding='VALID',
        dimension_numbers=('NCHW', 'OIHW', 'NCHW'),
        feature_group_count=Cin)
    y = lax.conv_general_dilated(
        y, w_pw, window_strides=(1, 1), padding='VALID',
        dimension_numbers=('NCHW', 'OIHW', 'NCHW'))
    return y + bias[None, :, None, None]


if __name__ == "__main__":
    # SeparableConv2d(in_channels=4, out_channels=8, kernel_size=3) on x: (2,4,16,16)
    N, Cin, H, W = 2, 4, 16, 16
    Cout, K = 8, 3

    key = jax.random.PRNGKey(0)
    k_x, k_dw, k_pw, k_b = jax.random.split(key, 4)

    x = jax.random.normal(k_x, (N, Cin, H, W), dtype=jnp.float32)
    # deterministic synthetic weights in torch Conv2d layouts
    w_dw = jax.random.normal(k_dw, (Cin, 1, K, K), dtype=jnp.float32) * 0.2
    w_pw = jax.random.normal(k_pw, (Cout, Cin, 1, 1), dtype=jnp.float32) * 0.2
    bias = jax.random.normal(k_b, (Cout,), dtype=jnp.float32) * 0.1

    out = separable_conv2d_nchw(x, w_dw, w_pw, bias)
    out = jax.block_until_ready(out)

    ref = jax.block_until_ready(_reference_nchw(x, w_dw, w_pw, bias))
    assert out.shape == (N, Cout, H - K + 1, W - K + 1), out.shape
    np.testing.assert_allclose(np.asarray(out), np.asarray(ref),
                               rtol=1e-4, atol=1e-4)

    print("KERNEL_OK")
</pallas_src>

<mosaic_0001>
module attributes {stable_mosaic.version = 11 : i64} {
  func.func @_sepconv_kernel(%arg0: i32, %arg1: memref<2x8x258xf32, #tpu.memory_space<vmem>>, %arg2: memref<8x72xf32, #tpu.memory_space<vmem>>, %arg3: memref<8x1xf32, #tpu.memory_space<vmem>>, %arg4: memref<2x8x224xf32, #tpu.memory_space<vmem>>) attributes {dimension_semantics = [#tpu.dimension_semantics<parallel>], iteration_bounds = array<i64: 1>, scalar_prefetch = 0 : i64, scratch_operands = 0 : i64, tpu.core_type = #tpu.core_type<tc>, window_params = [{transform_indices = @transform_0, window_bounds = array<i64: 2, 8, 258>}, {pipeline_mode = #tpu.pipeline_mode<synchronous>, transform_indices = @transform_1, window_bounds = array<i64: 8, 72>}, {pipeline_mode = #tpu.pipeline_mode<synchronous>, transform_indices = @transform_2, window_bounds = array<i64: 8, 1>}, {transform_indices = @transform_3, window_bounds = array<i64: 2, 8, 224>}]} {
    %c0 = arith.constant 0 : index
    %c0_0 = arith.constant 0 : index
    %0 = vector.load %arg2[%c0, %c0_0] : memref<8x72xf32, #tpu.memory_space<vmem>>, vector<8x72xf32>
    %c0_1 = arith.constant 0 : index
    %c0_2 = arith.constant 0 : index
    %1 = vector.load %arg3[%c0_1, %c0_2] : memref<8x1xf32, #tpu.memory_space<vmem>>, vector<8x1xf32>
    %c0_3 = arith.constant 0 : index
    %c0_4 = arith.constant 0 : index
    %c0_5 = arith.constant 0 : index
    %2 = vector.load %arg1[%c0_3, %c0_4, %c0_5] : memref<2x8x258xf32, #tpu.memory_space<vmem>>, vector<1x8x258xf32>
    %3 = vector.shape_cast %2 : vector<1x8x258xf32> to vector<8x258xf32>
    %4 = vector.extract_strided_slice %3 {offsets = [0, 0], sizes = [8, 224], strides = [1, 1]} : vector<8x258xf32> to vector<8x224xf32>
    %5 = vector.extract_strided_slice %3 {offsets = [0, 1], sizes = [8, 224], strides = [1, 1]} : vector<8x258xf32> to vector<8x224xf32>
    %6 = vector.extract_strided_slice %3 {offsets = [0, 2], sizes = [8, 224], strides = [1, 1]} : vector<8x258xf32> to vector<8x224xf32>
    %7 = vector.extract_strided_slice %3 {offsets = [0, 16], sizes = [8, 224], strides = [1, 1]} : vector<8x258xf32> to vector<8x224xf32>
    %8 = vector.extract_strided_slice %3 {offsets = [0, 17], sizes = [8, 224], strides = [1, 1]} : vector<8x258xf32> to vector<8x224xf32>
    %9 = vector.extract_strided_slice %3 {offsets = [0, 18], sizes = [8, 224], strides = [1, 1]} : vector<8x258xf32> to vector<8x224xf32>
    %10 = vector.extract_strided_slice %3 {offsets = [0, 32], sizes = [8, 224], strides = [1, 1]} : vector<8x258xf32> to vector<8x224xf32>
    %11 = vector.extract_strided_slice %3 {offsets = [0, 33], sizes = [8, 224], strides = [1, 1]} : vector<8x258xf32> to vector<8x224xf32>
    %12 = vector.extract_strided_slice %3 {offsets = [0, 34], sizes = [8, 224], strides = [1, 1]} : vector<8x258xf32> to vector<8x224xf32>
    %13 = tpu.concatenate %4, %5, %6, %7, %8, %9, %10, %11, %12 in 0 : vector<8x224xf32>, vector<8x224xf32>, vector<8x224xf32>, vector<8x224xf32>, vector<8x224xf32>, vector<8x224xf32>, vector<8x224xf32>, vector<8x224xf32>, vector<8x224xf32> -> vector<72x224xf32>
    %cst = arith.constant dense<0.000000e+00> : vector<8x224xf32>
    %14 = tpu.matmul %0, %13, %cst {dimension_numbers = #tpu.dot_dimension_numbers<[1], [0], [0], [1], [0, 0, 1, 1], [], []>} : vector<8x72xf32>, vector<72x224xf32>, vector<8x224xf32> -> vector<8x224xf32>
    %15 = vector.broadcast %1 : vector<8x1xf32> to vector<8x224xf32>
    %16 = arith.addf %14, %15 : vector<8x224xf32>
    %c0_6 = arith.constant 0 : index
    %c0_7 = arith.constant 0 : index
    %c0_8 = arith.constant 0 : index
    %17 = vector.load %arg4[%c0_6, %c0_7, %c0_8] : memref<2x8x224xf32, #tpu.memory_space<vmem>>, vector<1x8x224xf32>
    %18 = vector.shape_cast %17 : vector<1x8x224xf32> to vector<8x224xf32>
    %19 = vector.shape_cast %16 : vector<8x224xf32> to vector<1x8x224xf32>
    tpu.vector_store %arg4[%c0_6, %c0_7, %c0_8], %19 {strides = array<i32>} : memref<2x8x224xf32, #tpu.memory_space<vmem>>, vector<1x8x224xf32>,
    %c1 = arith.constant 1 : index
    %c0_9 = arith.constant 0 : index
    %c0_10 = arith.constant 0 : index
    %20 = vector.load %arg1[%c1, %c0_9, %c0_10] : memref<2x8x258xf32, #tpu.memory_space<vmem>>, vector<1x8x258xf32>
    %21 = vector.shape_cast %20 : vector<1x8x258xf32> to vector<8x258xf32>
    %22 = vector.extract_strided_slice %21 {offsets = [0, 0], sizes = [8, 224], strides = [1, 1]} : vector<8x258xf32> to vector<8x224xf32>
    %23 = vector.extract_strided_slice %21 {offsets = [0, 1], sizes = [8, 224], strides = [1, 1]} : vector<8x258xf32> to vector<8x224xf32>
    %24 = vector.extract_strided_slice %21 {offsets = [0, 2], sizes = [8, 224], strides = [1, 1]} : vector<8x258xf32> to vector<8x224xf32>
    %25 = vector.extract_strided_slice %21 {offsets = [0, 16], sizes = [8, 224], strides = [1, 1]} : vector<8x258xf32> to vector<8x224xf32>
    %26 = vector.extract_strided_slice %21 {offsets = [0, 17], sizes = [8, 224], strides = [1, 1]} : vector<8x258xf32> to vector<8x224xf32>
    %27 = vector.extract_strided_slice %21 {offsets = [0, 18], sizes = [8, 224], strides = [1, 1]} : vector<8x258xf32> to vector<8x224xf32>
    %28 = vector.extract_strided_slice %21 {offsets = [0, 32], sizes = [8, 224], strides = [1, 1]} : vector<8x258xf32> to vector<8x224xf32>
    %29 = vector.extract_strided_slice %21 {offsets = [0, 33], sizes = [8, 224], strides = [1, 1]} : vector<8x258xf32> to vector<8x224xf32>
    %30 = vector.extract_strided_slice %21 {offsets = [0, 34], sizes = [8, 224], strides = [1, 1]} : vector<8x258xf32> to vector<8x224xf32>
    %31 = tpu.concatenate %22, %23, %24, %25, %26, %27, %28, %29, %30 in 0 : vector<8x224xf32>, vector<8x224xf32>, vector<8x224xf32>, vector<8x224xf32>, vector<8x224xf32>, vector<8x224xf32>, vector<8x224xf32>, vector<8x224xf32>, vector<8x224xf32> -> vector<72x224xf32>
    %cst_11 = arith.constant dense<0.000000e+00> : vector<8x224xf32>
    %32 = tpu.matmul %0, %31, %cst_11 {dimension_numbers = #tpu.dot_dimension_numbers<[1], [0], [0], [1], [0, 0, 1, 1], [], []>} : vector<8x72xf32>, vector<72x224xf32>, vector<8x224xf32> -> vector<8x224xf32>
    %33 = vector.broadcast %1 : vector<8x1xf32> to vector<8x224xf32>
    %34 = arith.addf %32, %33 : vector<8x224xf32>
    %c1_12 = arith.constant 1 : index
    %c0_13 = arith.constant 0 : index
    %c0_14 = arith.constant 0 : index
    %35 = vector.load %arg4[%c1_12, %c0_13, %c0_14] : memref<2x8x224xf32, #tpu.memory_space<vmem>>, vector<1x8x224xf32>
    %36 = vector.shape_cast %35 : vector<1x8x224xf32> to vector<8x224xf32>
    %37 = vector.shape_cast %34 : vector<8x224xf32> to vector<1x8x224xf32>
    tpu.vector_store %arg4[%c1_12, %c0_13, %c0_14], %37 {strides = array<i32>} : memref<2x8x224xf32, #tpu.memory_space<vmem>>, vector<1x8x224xf32>,
    return
  }
  func.func @transform_0(%arg0: i32) -> (i32, i32, i32) {
    %c0_i32 = arith.constant 0 : i32
    %c0_i32_0 = arith.constant 0 : i32
    %c0_i32_1 = arith.constant 0 : i32
    return %arg0, %c0_i32, %c0_i32_0 : i32, i32, i32
  }
  func.func @transform_1(%arg0: i32) -> (i32, i32) {
    %c0_i32 = arith.constant 0 : i32
    %c0_i32_0 = arith.constant 0 : i32
    %c0_i32_1 = arith.constant 0 : i32
    return %c0_i32, %c0_i32_0 : i32, i32
  }
  func.func @transform_2(%arg0: i32) -> (i32, i32) {
    %c0_i32 = arith.constant 0 : i32
    %c0_i32_0 = arith.constant 0 : i32
    %c0_i32_1 = arith.constant 0 : i32
    return %c0_i32, %c0_i32_0 : i32, i32
  }
  func.func @transform_3(%arg0: i32) -> (i32, i32, i32) {
    %c0_i32 = arith.constant 0 : i32
    %c0_i32_0 = arith.constant 0 : i32
    %c0_i32_1 = arith.constant 0 : i32
    return %arg0, %c0_i32, %c0_i32_0 : i32, i32, i32
  }
}

</mosaic_0001>

<bundles_post_ra>
// kernel: separable_conv2d_nchw.1
= control target key start
LH: loop header
LB: loop body
LE: loop exit
PB: predicated region body
PF: predicated region fallthrough
CT: control target
= control target key end

     0   :  { %s368_s16 = smov 95   ;;  %s369_s17 = smov 94   ;;  %vm87_vm0 = vcmask 769024   ;;  %vm76_vm1 = vcmask 777216   ;;  %vm65_vm2 = vcmask 785408   ;;  %vm49_vm3 = vcmask 908288   ;;  %s477_s0 = inlined_call_operand.vmem [shape: f32[2,8,258], index: 0, kind: input, shape index: {}]   ;;  %s478_s2 = inlined_call_operand.vmem [shape: f32[8,1], index: 2, kind: input, shape index: {}]   ;;  %s479_s1 = inlined_call_operand.vmem [shape: f32[8,72], index: 1, kind: input, shape index: {}]   ;;  %s480_s3 = inlined_call_operand.vmem [shape: f32[2,8,224], index: 3, kind: output, shape index: {}]  }
   0x1   :  { %v400_v0 = vld [vmem:[%s477_s0 + $0x18] sm:$0xff]  ;;  %v405_v1 = vld [vmem:[%s477_s0 + $0x20] sm:$0xff]  ;;  %v263_v4 = vld [vmem:[%s477_s0 + $0x28] sm:$0xff]  ;;  %s370_s22 = smov 96   ;;  %s371_s27 = smov 110   ;;  %vm57_vm4 = vcmask 900096  }
   0x2   :  { %v287_v2 = vpack.i.bf16 %v405_v1, %v400_v0  ;;  %v412_v3 = vld [vmem:[%s477_s0] sm:$0xff]  ;;  %v421_v6 = vld [vmem:[%s477_s0 + $0x8] sm:$0xff]  ;;  %v18_v7 = vld [vmem:[%s477_s0 + $0x10] sm:$0xff]  ;;  %s372_s28 = smov 111   ;;  %s373_s29 = smov 112   ;;  %v376_v50 = vmov 0  }
   0x3   :  { %v292_v5 = vpack.i.bf16 %v412_v3, %v263_v4  ;;  %v302_v8 = vpack.i.bf16 %v18_v7, %v421_v6  ;;  %v322_v9 = vpack.i.bf16 %v421_v6, %v412_v3  ;;  %s374_s30 = smov 126   ;;  %s375_s0 = smov 127   ;;  %v15_v49 = vld [vmem:[%s478_s2] sm:$0xff]  ;;  %367 = vset.pattern.permute.xlu0 %v376_v50  ;;  %vm41_vm5 = vcmask 916480  }
   0x4   :  { %288 = vrot.lane.b32.xlu1 %v287_v2, %s368_s16  ;;  %278 = vrot.lane.b32.xlu0 %v287_v2, %s369_s17  ;;  %vm33_vm6 = vcmask 1031168   ;;  %vm25_vm7 = vcmask 1039360   ;;  %vm97_vm8 = vcmask 588800  }
   0x5   :  { %298 = vrot.lane.b32.xlu2 %v287_v2, %s370_s22 }
   0xc   :  { %293 = vrot.lane.b32.xlu1 %v292_v5, %s368_s16  ;;  %283 = vrot.lane.b32.xlu0 %v292_v5, %s369_s17 }
   0xd   :  { %303 = vrot.lane.b32.xlu2 %v302_v8, %s369_s17 }
  0x14   :  { %313 = vrot.lane.b32.xlu1 %v302_v8, %s368_s16  ;;  %308 = vrot.lane.b32.xlu0 %v287_v2, %s371_s27 }
  0x15   :  { %318 = vrot.lane.b32.xlu2 %v287_v2, %s372_s28 }
  0x1c   :  { %323 = vrot.lane.b32.xlu0 %v322_v9, %s370_s22  ;;  %328 = vrot.lane.b32.xlu1 %v287_v2, %s373_s29 }
  0x1d   :  { %333 = vrot.lane.b32.xlu2 %v322_v9, %s371_s27 }
  0x24   :  { %338 = vrot.lane.b32.xlu0 %v287_v2, %s374_s30  ;;  %343 = vrot.lane.b32.xlu1 %v322_v9, %s372_s28 }
  0x25   :  { %348 = vrot.lane.b32.xlu2 %v287_v2, %s375_s0 }
  0x2c   :  { %353 = vrot.lane.b32.xlu0 %v322_v9, %s373_s29  ;;  %358 = vrot.lane.b32.xlu1 %v322_v9, %s374_s30 }
  0x2d   :  { %363 = vrot.lane.b32.xlu2 %v322_v9, %s375_s0 }
  0x34   :  { %94 = vperm.xlu0 %367, %v15_v49  }
  0x5f   :  { %v299_v10 = vpop.permute.xlu2 %298 }
  0x60   :  { %v301_v15 = vunpack.i.h.bf16 %v299_v10  ;;  %v300_v16 = vunpack.i.l.bf16 %v299_v10 }
  0x62   :  { %v188_v25 = vsel %vm65_vm2, %v300_v16, %v301_v15 }
  0x67   :  { %v304_v11 = vpop.permute.xlu2 %303 }
  0x68   :  { %v306_v12 = vunpack.i.h.bf16 %v304_v11  ;;  %v305_v13 = vunpack.i.l.bf16 %v304_v11 }
  0x6a   :  { %v89_v14 = vsel %vm87_vm0, %v305_v13, %v306_v12 }
  0x6b   :  { %128 = vmatpush.msra.mxu1 %v89_v14 }
  0x6f   :  { %v319_v26 = vpop.permute.xlu2 %318 }
  0x70   :  { %v320_v35 = vunpack.i.l.bf16 %v319_v26  ;;  %v321_v36 = vunpack.i.h.bf16 %v319_v26 }
  0x72   :  { %v174_v45 = vsel %vm49_vm3, %v320_v35, %v321_v36 }
  0x76   :  { %v289_v17 = vpop.permute.xlu1 %288  ;;  %v279_v18 = vpop.permute.xlu0 %278 }
  0x77   :  { %v291_v19 = vunpack.i.h.bf16 %v289_v17  ;;  %v290_v20 = vunpack.i.l.bf16 %v289_v17  ;;  %v281_v21 = vunpack.i.h.bf16 %v279_v18  ;;  %v280_v22 = vunpack.i.l.bf16 %v279_v18  ;;  %v334_v44 = vpop.permute.xlu2 %333 }
  0x78   :  { %v335_v51 = vunpack.i.l.bf16 %v334_v44  ;;  %v336_v52 = vunpack.i.h.bf16 %v334_v44 }
  0x79   :  { %v208_v23 = vsel %vm87_vm0, %v280_v22, %v281_v21  ;;  %v198_v24 = vsel %vm76_vm1, %v290_v20, %v291_v19 }
  0x7a   :  { %219 = vmatpush.msra.mxu2 %v208_v23  ;;  %v58_v61 = vsel %vm57_vm4, %v335_v51, %v336_v52 }
  0x7c   :  { %220 = vmatpush.msra.mxu2 %v198_v24 }
  0x7e   :  { %221 = vmatpush.msra.mxu2 %v188_v25  ;;  %v294_v27 = vpop.permute.xlu1 %293  ;;  %v284_v28 = vpop.permute.xlu0 %283 }
  0x7f   :  { %v295_v29 = vunpack.i.l.bf16 %v294_v27  ;;  %v286_v30 = vunpack.i.h.bf16 %v284_v28  ;;  %v285_v31 = vunpack.i.l.bf16 %v284_v28  ;;  %v296_v37 = vunpack.i.h.bf16 %v294_v27  ;;  %v349_v62 = vpop.permute.xlu2 %348 }
  0x80   :  { %v350_v63 = vunpack.i.l.bf16 %v349_v62  ;;  %v351_v2 = vunpack.i.h.bf16 %v349_v62 }
  0x81   :  { %v88_v32 = vsel %vm87_vm0, %v286_v30, %v305_v13  ;;  %v209_v33 = vsel %vm87_vm0, %v281_v21, %v285_v31  ;;  %v199_v34 = vsel %vm76_vm1, %v291_v19, %v295_v29 }
  0x82   :  { %108 = vmatpush.msra.mxu0 %v88_v32  ;;  %239 = vmatpush.msra.mxu3 %v209_v33  ;;  %v153_v13 = vsel %vm25_vm7, %v350_v63, %v351_v2 }
  0x84   :  { %240 = vmatpush.msra.mxu3 %v199_v34 }
  0x86   :  { %v314_v38 = vpop.permute.xlu1 %313  ;;  %v309_v39 = vpop.permute.xlu0 %308  ;;  %241 = vmatpush.msra.mxu3 %v301_v15  ;;  %v14_v15 = vld [vmem:[%s479_s1] sm:$0xff] }
  0x87   :  { %v316_v40 = vunpack.i.h.bf16 %v314_v38  ;;  %v315_v41 = vunpack.i.l.bf16 %v314_v38  ;;  %v310_v42 = vunpack.i.l.bf16 %v309_v39  ;;  %v311_v43 = vunpack.i.h.bf16 %v309_v39  ;;  %v364_v14 = vpop.permute.xlu2 %363 }
  0x88   :  { %v366_v18 = vunpack.i.h.bf16 %v364_v14  ;;  %v365_v19 = vunpack.i.l.bf16 %v364_v14 }
  0x89   :  { %242 = vmatpush.msra.mxu3 %v311_v43  ;;  %v77_v46 = vsel %vm76_vm1, %v296_v37, %v315_v41  ;;  %v181_v47 = vsel %vm57_vm4, %v310_v42, %v311_v43  ;;  %v78_v48 = vsel %vm76_vm1, %v315_v41, %v316_v40 }
  0x8a   :  { %109 = vmatpush.msra.mxu0 %v77_v46  ;;  %222 = vmatpush.msra.mxu2 %v181_v47 }
  0x8b   :  { %129 = vmatpush.msra.mxu1 %v78_v48  ;;  %243 = vmatpush.msra.mxu3 %v321_v36 }
  0x8c   :  { %223 = vmatpush.msra.mxu2 %v174_v45 }
  0x8e   :  { %v324_v53 = vpop.permute.xlu0 %323  ;;  %v329_v54 = vpop.permute.xlu1 %328 }
  0x8f   :  { %v325_v55 = vunpack.i.l.bf16 %v324_v53  ;;  %v330_v56 = vunpack.i.l.bf16 %v329_v54  ;;  %v326_v57 = vunpack.i.h.bf16 %v324_v53  ;;  %v331_v58 = vunpack.i.h.bf16 %v329_v54 }
  0x91   :  { %130 = vmatpush.msra.mxu1 %v326_v57  ;;  %v66_v59 = vsel %vm65_vm2, %v325_v55, %v326_v57  ;;  %244 = vmatpush.msra.mxu3 %v331_v58  ;;  %v167_v60 = vsel %vm41_vm5, %v330_v56, %v331_v58 }
  0x92   :  { %110 = vmatpush.msra.mxu0 %v66_v59  ;;  %224 = vmatpush.msra.mxu2 %v167_v60 }
  0x93   :  { %131 = vmatpush.msra.mxu1 %v336_v52 }
  0x94   :  { %111 = vmatpush.msra.mxu0 %v58_v61 }
  0x96   :  { %v339_v4 = vpop.permute.xlu0 %338  ;;  %v344_v5 = vpop.permute.xlu1 %343 }
  0x97   :  { %v340_v7 = vunpack.i.l.bf16 %v339_v4  ;;  %v345_v8 = vunpack.i.l.bf16 %v344_v5  ;;  %v341_v9 = vunpack.i.h.bf16 %v339_v4  ;;  %v346_v10 = vunpack.i.h.bf16 %v344_v5 }
  0x99   :  { %245 = vmatpush.msra.mxu3 %v341_v9  ;;  %v160_v11 = vsel %vm33_vm6, %v340_v7, %v341_v9  ;;  %132 = vmatpush.msra.mxu1 %v346_v10  ;;  %v50_v12 = vsel %vm49_vm3, %v345_v8, %v346_v10 }
  0x9a   :  { %225 = vmatpush.msra.mxu2 %v160_v11  ;;  %112 = vmatpush.msra.mxu0 %v50_v12 }
  0x9b   :  { %246 = vmatpush.msra.mxu3 %v351_v2 }
  0x9c   :  { %226 = vmatpush.msra.mxu2 %v153_v13 }
  0x9d   :  { %247 = vmatpush.msra.mxu3 %v405_v1  ;;  %v26_v1 = vsel %vm25_vm7, %v365_v19, %v366_v18 }
  0x9e   :  { %v354_v16 = vpop.permute.xlu0 %353  ;;  %v359_v17 = vpop.permute.xlu1 %358  ;;  %227 = vmatpush.msra.mxu2 %v400_v0  ;;  %265 = vmatmul.msk.f32.vlgmr.msra.gmra.mxu3 %vm97_vm8, %v14_v15 }
  0x9f   :  { %v355_v20 = vunpack.i.l.bf16 %v354_v16  ;;  %v361_v21 = vunpack.i.h.bf16 %v359_v17  ;;  %v360_v22 = vunpack.i.l.bf16 %v359_v17  ;;  %v356_v23 = vunpack.i.h.bf16 %v354_v16  ;;  %264 = vmatmul.msk.f32.vlgmr.msra.gmra.mxu2 %vm97_vm8, %v14_v15 }
  0xa1   :  { %133 = vmatpush.msra.mxu1 %v356_v23  ;;  %v42_v24 = vsel %vm41_vm5, %v355_v20, %v356_v23  ;;  %v34_v25 = vsel %vm33_vm6, %v360_v22, %v361_v21 }
  0xa2   :  { %113 = vmatpush.msra.mxu0 %v42_v24 }
  0xa3   :  { %134 = vmatpush.msra.mxu1 %v361_v21 }
  0xa4   :  { %114 = vmatpush.msra.mxu0 %v34_v25 }
  0xa5   :  { %135 = vmatpush.msra.mxu1 %v366_v18 }
  0xa6   :  { %115 = vmatpush.msra.mxu0 %v26_v1  ;;  %v95_v0 = vpop.permute.xlu0 %94 }
  0xa7   :  { %136 = vmatpush.msra.mxu1 %v421_v6 }
  0xa8   :  { %116 = vmatpush.msra.mxu0 %v412_v3  ;;  %260 = vmatmul.msk.f32.vlgmr.msra.gmra.mxu1 %vm97_vm8, %v14_v15 }
  0xa9   :  { %259 = vmatmul.msk.f32.vlgmr.msra.gmra.mxu0 %vm97_vm8, %v14_v15 }
 0x121   :  { %v249_v26 = vpop.f32.mrf.mxu3 }
 0x122   :  { %v229_v27 = vpop.f32.mrf.mxu2  ;;  %v250_v28 = vadd.f32 %v249_v26, %v95_v0 }
 0x123   :  { %v230_v29 = vadd.f32 %v229_v27, %v95_v0 }
 0x124   :  { %267 = vst.msk [vmem:[%s480_s3 + $0x18] sm:$0xff] %vm65_vm2, %v250_v28 }
 0x125   :  { %v138_v30 = vpop.f32.mrf.mxu1  ;;  %266 = vst [vmem:[%s480_s3 + $0x10] sm:$0xff] %v230_v29 }
 0x126   :  { %v118_v3 = vpop.f32.mrf.mxu0  ;;  %v139_v6 = vadd.f32 %v138_v30, %v95_v0 }
 0x127   :  { %v119_v31 = vadd.f32 %v118_v3, %v95_v0 }
 0x128   :  { %142 = vst.msk [vmem:[%s480_s3 + $0x8] sm:$0xff] %vm65_vm2, %v139_v6 }
 0x129   :  { %141 = vst [vmem:[%s480_s3] sm:$0xff] %v119_v31 }

</bundles_post_ra>
